<compile_context>
chip_gen: v5e
topology: v5e:2x2
jax: 0.10.0
libtpu: 0.0.40
codegen_flags: <defaults>
</compile_context>

<pallas_src>
import math

import jax
import jax.numpy as jnp
from jax.experimental import pallas as pl
from jax.experimental.pallas import tpu as pltpu


def _gated_connector_kernel(gate_ref, x_ref, o_ref):
    # gate_ref: (1, D_eff) -- tanh(alpha) already applied, in the output dtype.
    # x_ref/o_ref: (row_tile, D_eff).
    o_ref[...] = gate_ref[...] * x_ref[...].astype(o_ref.dtype)


def _round_down(x, m):
    return (x // m) * m


def _round_up(x, m):
    return ((x + m - 1) // m) * m


def _choose_row_tile(rows_eff, dim_eff, in_item, out_item, target_block_bytes):
    """Pick the row-tile for the (rows_eff, dim_eff) lane-dense view."""
    # Sublane pack for the narrowest dtype involved: f32->8, bf16->16, i8->32.
    sub = max(8, 32 // max(1, min(in_item, out_item)))
    if rows_eff <= sub:
        return rows_eff  # full-extent block along rows (allowed even if < 8)

    row_bytes = dim_eff * max(in_item, out_item)

    # Bytes-based tile (~2-4 MiB blocks); no hard row-count cap.
    tile = max(sub, _round_down(target_block_bytes // row_bytes, sub))

    # VMEM cap: (x-in + out) x 2 pipeline buffers <= ~24 MiB, leaving headroom
    # under the 32 MiB scoped VMEM limit (v7x has only 64 MiB/TC total).
    per_row_live = 2 * dim_eff * (in_item + out_item)
    vmem_cap = max(sub, _round_down((24 << 20) // per_row_live, sub))
    tile = min(tile, vmem_cap)

    # v7x megacore: prefer >= 8 evenly-balanced steps (>= 4 per TensorCore)
    # as long as every block stays >= ~1 MiB.  On single-TC v5e/v6e the extra
    # 0.35us/step is fully hidden behind the multi-us block DMA at this size.
    min_block_rows = max(sub, _round_up(pl.cdiv(1 << 20, row_bytes), sub))
    max_steps = max(1, rows_eff // min_block_rows)
    steps = pl.cdiv(rows_eff, tile)
    desired = steps
    if desired < 8:
        desired = min(8, max_steps)
    if 2 <= desired <= 16 and desired % 2 == 1 and desired + 1 <= max_steps:
        desired += 1  # even step count -> no 33-50% core-load imbalance on v7x
    if desired > steps:
        tile = max(sub, _round_up(pl.cdiv(rows_eff, desired), sub))
        tile = min(tile, vmem_cap)

    # Never make the block taller than the array (ragged final block is fine).
    return min(tile, max(sub, _round_down(rows_eff, sub)))


def _pallas_scale(x_eff, gate_eff, out_dtype, target_block_bytes):
    """out = gate_eff * x_eff, lane-dense 2-D view (rows_eff, dim_eff)."""
    rows_eff, dim_eff = x_eff.shape
    in_item = jnp.dtype(x_eff.dtype).itemsize
    out_item = jnp.dtype(out_dtype).itemsize
    row_tile = _choose_row_tile(rows_eff, dim_eff, in_item, out_item,
                                target_block_bytes)
    grid = (pl.cdiv(rows_eff, row_tile),)

    return pl.pallas_call(
        _gated_connector_kernel,
        out_shape=jax.ShapeDtypeStruct((rows_eff, dim_eff), out_dtype),
        grid_spec=pltpu.PrefetchScalarGridSpec(
            num_scalar_prefetch=0,
            grid=grid,
            in_specs=[
                # Gate: same block every step -> stays VMEM-resident.
                pl.BlockSpec((1, dim_eff), lambda i: (0, 0)),
                # Streaming x tile.  Optional v7x sweep: pipeline_mode=pl.Buffered(3).
                pl.BlockSpec((row_tile, dim_eff), lambda i: (i, 0)),
            ],
            out_specs=pl.BlockSpec((row_tile, dim_eff), lambda i: (i, 0)),
        ),
        compiler_params=pltpu.CompilerParams(
            dimension_semantics=("parallel",),
            vmem_limit_bytes=32 * 1024 * 1024,
        ),
    )(gate_eff, x_eff)


def gated_connector(x, alpha, *, target_block_bytes=4 << 20):
    """out = tanh(alpha) * x.  x: [..., dim], alpha: [dim]."""
    orig_shape = x.shape
    dim = orig_shape[-1]
    assert alpha.shape == (dim,)

    # PyTorch type promotion: f32 alpha * bf16 x -> f32 out.
    out_dtype = jnp.promote_types(x.dtype, alpha.dtype)
    # Gate precomputed once (O(dim)), tanh in f32, then cast to compute dtype.
    gate = jnp.tanh(alpha.astype(jnp.float32)).astype(out_dtype)

    x2d = x.reshape(-1, dim)
    rows = x2d.shape[0]
    if rows == 0:
        return jnp.zeros(orig_shape, out_dtype)

    # ---- Lane-dense folding: make the block's last dim a multiple of 128 ----
    fold = 1
    if dim % 128 != 0:
        fold = 128 // math.gcd(dim, 128)

    rows_bulk = _round_down(rows, fold)
    parts = []

    if rows_bulk > 0:
        dim_eff = dim * fold
        rows_eff = rows_bulk // fold
        x_bulk = x2d if rows_bulk == rows else x2d[:rows_bulk]
        x_eff = x_bulk.reshape(rows_eff, dim_eff)
        gate_eff = (jnp.tile(gate, fold) if fold > 1 else gate).reshape(1, dim_eff)
        out_bulk = _pallas_scale(x_eff, gate_eff, out_dtype, target_block_bytes)
        parts.append(out_bulk.reshape(rows_bulk, dim))

    if rows_bulk < rows:
        # At most fold-1 (< 128) leftover rows: negligible traffic, plain jnp.
        parts.append(x2d[rows_bulk:].astype(out_dtype) * gate)

    out2d = parts[0] if len(parts) == 1 else jnp.concatenate(parts, axis=0)
    return out2d.reshape(orig_shape)


if __name__ == "__main__":
    key = jax.random.PRNGKey(0)
    k_alpha, k_x = jax.random.split(key)

    batch, seq, dim = 2, 8, 32
    # Module __init__ uses zeros(dim); use deterministic random values here so
    # the test is non-trivial (same shapes, synthetic weights).
    alpha = jax.random.normal(k_alpha, (dim,), dtype=jnp.float32) * 0.1
    x = jax.random.normal(k_x, (batch, seq, dim), dtype=jnp.float32)

    out = gated_connector(x, alpha)
    out = jax.block_until_ready(out)

    # Reference check (plain JAX)
    ref = jnp.tanh(alpha) * x
    assert out.shape == x.shape
    assert out.dtype == ref.dtype
    assert jnp.allclose(out, ref, atol=1e-6, rtol=1e-6)

    print("KERNEL_OK")
</pallas_src>

<mosaic_0001>
module attributes {stable_mosaic.version = 11 : i64} {
  func.func @_gated_connector_kernel(%arg0: i32, %arg1: memref<1x128xf32, #tpu.memory_space<vmem>>, %arg2: memref<4x128xf32, #tpu.memory_space<vmem>>, %arg3: memref<4x128xf32, #tpu.memory_space<vmem>>) attributes {dimension_semantics = [#tpu.dimension_semantics<parallel>], iteration_bounds = array<i64: 1>, scalar_prefetch = 0 : i64, scratch_operands = 0 : i64, tpu.core_type = #tpu.core_type<tc>, window_params = [{pipeline_mode = #tpu.pipeline_mode<synchronous>, transform_indices = @transform_0, window_bounds = array<i64: 1, 128>}, {transform_indices = @transform_1, window_bounds = array<i64: 4, 128>}, {transform_indices = @transform_2, window_bounds = array<i64: 4, 128>}]} {
    %c0 = arith.constant 0 : index
    %c0_0 = arith.constant 0 : index
    %0 = vector.load %arg1[%c0, %c0_0] : memref<1x128xf32, #tpu.memory_space<vmem>>, vector<1x128xf32>
    %c0_1 = arith.constant 0 : index
    %c0_2 = arith.constant 0 : index
    %1 = vector.load %arg2[%c0_1, %c0_2] : memref<4x128xf32, #tpu.memory_space<vmem>>, vector<4x128xf32>
    %2 = vector.broadcast %0 : vector<1x128xf32> to vector<4x128xf32>
    %3 = arith.mulf %2, %1 : vector<4x128xf32>
    %c0_3 = arith.constant 0 : index
    %c0_4 = arith.constant 0 : index
    %4 = vector.load %arg3[%c0_3, %c0_4] : memref<4x128xf32, #tpu.memory_space<vmem>>, vector<4x128xf32>
    tpu.vector_store %arg3[%c0_3, %c0_4], %3 {strides = array<i32>} : memref<4x128xf32, #tpu.memory_space<vmem>>, vector<4x128xf32>,
    return
  }
  func.func @transform_0(%arg0: i32) -> (i32, i32) {
    %c0_i32 = arith.constant 0 : i32
    %c0_i32_0 = arith.constant 0 : i32
    %c0_i32_1 = arith.constant 0 : i32
    return %c0_i32, %c0_i32_0 : i32, i32
  }
  func.func @transform_1(%arg0: i32) -> (i32, i32) {
    %c0_i32 = arith.constant 0 : i32
    %c0_i32_0 = arith.constant 0 : i32
    return %arg0, %c0_i32 : i32, i32
  }
  func.func @transform_2(%arg0: i32) -> (i32, i32) {
    %c0_i32 = arith.constant 0 : i32
    %c0_i32_0 = arith.constant 0 : i32
    return %arg0, %c0_i32 : i32, i32
  }
}

</mosaic_0001>

<bundles_post_ra>
// kernel: tpu_custom_call.1
= control target key start
LH: loop header
LB: loop body
LE: loop exit
PB: predicated region body
PF: predicated region fallthrough
CT: control target
= control target key end

     0   :  { %7 = vsyncpa [#allocation3], 0  ;;  %s174_s0 = inlined_call_operand.hbm [shape: f32[1,128], index: 0, kind: input, shape index: {}]   ;;  %s175_s1 = inlined_call_operand.hbm [shape: f32[4,128], index: 1, kind: input, shape index: {}]   ;;  %s176_s2 = inlined_call_operand.hbm [shape: f32[4,128], index: 2, kind: output, shape index: {}]  }
   0x1   :  { %8 = vsyncpa [#allocation6], 0 }
   0x2   :  { %9 = vsyncpa [#allocation4], 0  ;;  %s15_s11 = sshll.u32 %s174_s0, 4  ;;  %s147_s12 = smov [#allocation2]   ;;  %s16_s11 = int_to_ptr.hbm [resolvable:$true] %s15_s11 }
   0x3   :  { %s17_s13 = sshll.u32 %s147_s12, 4  ;;  %s26_s16 = sshll.u32 %s175_s1, 4  ;;  %s18_s13 = int_to_ptr.vmem [resolvable:$true] %s17_s13  ;;  %s27_s16 = int_to_ptr.hbm [resolvable:$true] %s26_s16 }
   0x4   :  { %20 = dma.hbm_to_vmem [thread:$0]  %s16_s11, 16, %s18_s13, [#allocation3]  }
   0x5   :  { %s148_s17 = smov [#allocation5]  }
   0x6   :  { %s28_s18 = sshll.u32 %s148_s17, 4  ;;  %s29_s18 = int_to_ptr.vmem [resolvable:$true] %s28_s18 }
   0x7   :  { %31 = dma.hbm_to_vmem [thread:$0]  %s27_s16, 64, %s29_s18, [#allocation6]  }
   0x8   :  { %141 = dma.done.wait [#allocation3], 16  }
   0x9   :  { %142 = vsyncadd [#allocation3], 4294967280 }
   0xa   :  { %143 = dma.done.wait [#allocation6], 64  }
   0xb   :  { %144 = vsyncadd [#allocation6], 4294967232  ;;  %s149_s19 = smov [#allocation7]   ;;  %s54_s22 = sshll.u32 %s176_s2, 4  ;;  %v41_v0 = vld [vmem:[#allocation5] sm:$0xf]  ;;  %s55_s22 = int_to_ptr.hbm [resolvable:$true] %s54_s22 }
   0xc   :  { %s52_s0 = sshll.u32 %s149_s19, 4  ;;  %v68_v1 = vld [vmem:[#allocation2] ss:$0 sm:$0xff]  ;;  %s53_s0 = int_to_ptr.vmem [resolvable:$true] %s52_s0 }
   0xd   :  { %v45_v2 = vmul.f32 %v68_v1, %v41_v0 }
   0xf   :  { %46 = vst [vmem:[#allocation7] sm:$0xf] %v45_v2 }
  0x10   :  { %57 = dma.vmem_to_hbm [thread:$0]  %s53_s0, 64, %s55_s22, [#allocation4]  }
  0x11   :  { %145 = dma.done.wait [#allocation4], 64  }
  0x12   :  { %146 = vsyncadd [#allocation4], 4294967232 }
  0x13   :  { %62 = vsyncpa [#allocation3], 1 }
  0x14   :  { %63 = vsyncpa [#allocation6], 1 }
  0x15   :  { %64 = vsyncpa [#allocation4], 1 }

</bundles_post_ra>
